<compile_context>
chip_gen: v5e
topology: v5e:2x2
jax: 0.10.0
libtpu: 0.0.40
codegen_flags: <defaults>
</compile_context>

<pallas_src>
import jax
import jax.numpy as jnp
from jax.experimental import pallas as pl
from jax.experimental.pallas import tpu as pltpu


def _round_up(x, m):
    return (x + m - 1) // m * m


def _vmem_capacity_bytes():
    try:
        return int(pltpu.get_tpu_info().vmem_capacity_bytes)
    except Exception:
        return 64 << 20  # conservative fallback: v7x per-core VMEM


def outconv_kernel(x_ref, w_ref, b_ref, o_ref):
    # x_ref : (TB, C_in, TL)   lane-dense length tile
    # w_ref : (C_out, C_in)    grid-invariant (resident)
    # b_ref : (C_out, 1)       grid-invariant (resident), f32
    # o_ref : (TB, C_out, TL)
    w = w_ref[...]
    # Hoist the bias broadcast out of the (unrolled) batch loop: JAX does not
    # CSE broadcast_in_dim, so doing it per row would emit TB broadcasts.
    bb = jnp.broadcast_to(b_ref[...], (o_ref.shape[1], o_ref.shape[2]))
    # TB is a static block dim -> this Python loop unrolls at trace time.
    # TB is 1 in the common case (TL is grown before batch rows are folded).
    for i in range(x_ref.shape[0]):
        y = jnp.dot(w, x_ref[i], preferred_element_type=jnp.float32) + bb
        o_ref[i] = y.astype(o_ref.dtype)


def _choose_tiles(N, C_in, C_out, L, itemsize, vmem_cap):
    """Pick (TB, TL): lane-dense, VMEM-budgeted, big enough per grid step."""
    # Dtype-aware (sublane, lane) padding of the VMEM tiles.
    sub = max(8, 32 // itemsize)            # f32: 8, bf16: 16, int8: 32
    cin_p = _round_up(C_in, sub)
    cout_p = _round_up(C_out, sub)

    # Double-buffered x+o tile budget: ~40% of physical VMEM leaves room for
    # the resident weight/bias and compiler scratch
    # (~25 MiB on v7x, ~51 MiB on v5e/v6e).
    budget = int(vmem_cap * 0.4)
    target_step_bytes = 8 << 20             # per-grid-step HBM traffic target

    def db_bytes(tb, tl):
        tl_p = _round_up(tl, 128)
        return 2 * tb * (cin_p + cout_p) * tl_p * itemsize

    # Length tile first: the biggest 128-multiple the budget allows.
    if L <= 128:
        tl = L                              # full-dim block (allowed)
    else:
        max_tl_budget = (budget // (2 * (cin_p + cout_p) * itemsize)) // 128 * 128
        tl = max(128, min(max_tl_budget, (L // 128) * 128))
        # Keep at least two length tiles when they are the only source of grid
        # parallelism, so v7x's second TensorCore gets work.
        if N == 1 and L > 256:
            tl = min(tl, max(128, _round_up(-(-L // 2), 128)))

    # Fold batch rows only after TL is maxed, until per-step DMA traffic hits
    # the target or the VMEM budget runs out.
    def step_bytes(tb):
        return tb * (C_in + C_out) * min(tl, L) * itemsize

    tb = 1
    while (
        tb < N
        and N % (tb * 2) == 0
        and db_bytes(tb * 2, tl) <= budget
        and step_bytes(tb) < target_step_bytes
    ):
        tb *= 2
    return tb, tl


def outconv(x, weight, bias):
    """Pointwise Conv1d (kernel_size=1): PyTorch OutConv forward.

    Args:
      x:      (N, C_in, L)
      weight: (C_out, C_in)   (PyTorch Conv1d weight (C_out, C_in, 1) squeezed)
      bias:   (C_out,)
    Returns:
      (N, C_out, L), dtype of x.
    """
    N, C_in, L = x.shape
    C_out = weight.shape[0]
    itemsize = jnp.dtype(x.dtype).itemsize

    # Tiny resident operands: W cast to x.dtype (native bf16 MXU path for bf16
    # activations; f32 accumulation via preferred_element_type), bias in f32.
    w = weight.astype(x.dtype)
    b2d = bias.reshape(C_out, 1).astype(jnp.float32)

    vmem_cap = _vmem_capacity_bytes()
    tb, tl = _choose_tiles(N, C_in, C_out, L, itemsize, vmem_cap)

    n_steps = N // tb
    l_steps = pl.cdiv(L, tl)

    # Put the axis with more steps first so megacore ("parallel") sharding on
    # v7x splits the larger axis across its two TensorCores.
    if l_steps >= n_steps:
        grid = (l_steps, n_steps)
        x_map = lambda l, n: (n, 0, l)
        o_map = lambda l, n: (n, 0, l)
        c_map = lambda l, n: (0, 0)
    else:
        grid = (n_steps, l_steps)
        x_map = lambda n, l: (n, 0, l)
        o_map = lambda n, l: (n, 0, l)
        c_map = lambda n, l: (0, 0)

    # Explicit VMEM limit from the chosen tiles (dtype-aware padding), with
    # headroom, capped at 75% of physical VMEM (~48 MiB on v7x).
    sub = max(8, 32 // itemsize)
    tl_p = _round_up(tl, 128)
    x_pad = tb * _round_up(C_in, sub) * tl_p * itemsize
    o_pad = tb * _round_up(C_out, sub) * tl_p * itemsize
    w_pad = _round_up(C_out, sub) * _round_up(C_in, 128) * itemsize
    b_pad = _round_up(C_out, 8) * 128 * 4
    vmem_limit = 2 * (x_pad + o_pad) + w_pad + b_pad + (4 << 20)
    vmem_limit = int(min(max(vmem_limit, 16 << 20), int(vmem_cap * 0.75)))

    return pl.pallas_call(
        outconv_kernel,
        out_shape=jax.ShapeDtypeStruct((N, C_out, L), x.dtype),
        grid_spec=pltpu.PrefetchScalarGridSpec(
            num_scalar_prefetch=0,
            grid=grid,
            in_specs=[
                pl.BlockSpec((tb, C_in, tl), x_map),
                pl.BlockSpec((C_out, C_in), c_map),
                pl.BlockSpec((C_out, 1), c_map),
            ],
            out_specs=pl.BlockSpec((tb, C_out, tl), o_map),
        ),
        compiler_params=pltpu.CompilerParams(
            dimension_semantics=("parallel", "parallel"),
            vmem_limit_bytes=vmem_limit,
        ),
    )(x, w, b2d)


def outconv_reference(x, weight, bias):
    # Pure-JAX reference for the same math.
    return jnp.einsum("oc,ncl->nol", weight, x) + bias[None, :, None]


if __name__ == "__main__":
    key = jax.random.PRNGKey(0)

    # Small shape consistent with the module: batch=2, in_channels=4,
    # out_channels=3, length=16 (Conv1d weight (C_out, C_in, 1) squeezed).
    kx, kw, kb, k2 = jax.random.split(key, 4)
    N, C_in, C_out, L = 2, 4, 3, 16
    x = jax.random.normal(kx, (N, C_in, L), dtype=jnp.float32)
    weight = jax.random.normal(kw, (C_out, C_in), dtype=jnp.float32) * 0.1
    bias = jax.random.normal(kb, (C_out,), dtype=jnp.float32) * 0.1

    out = jax.block_until_ready(outconv(x, weight, bias))
    ref = outconv_reference(x, weight, bias)
    assert out.shape == (N, C_out, L)
    assert jnp.allclose(out, ref, atol=1e-5, rtol=1e-5)

    # Second check exercises the non-128-divisible-L path (masked partial
    # last length tile).
    kx2, kw2, kb2 = jax.random.split(k2, 3)
    N2, C_in2, C_out2, L2 = 2, 8, 5, 300
    x2 = jax.random.normal(kx2, (N2, C_in2, L2), dtype=jnp.float32)
    weight2 = jax.random.normal(kw2, (C_out2, C_in2), dtype=jnp.float32) * 0.1
    bias2 = jax.random.normal(kb2, (C_out2,), dtype=jnp.float32) * 0.1

    out2 = jax.block_until_ready(outconv(x2, weight2, bias2))
    ref2 = outconv_reference(x2, weight2, bias2)
    assert out2.shape == (N2, C_out2, L2)
    assert jnp.allclose(out2, ref2, atol=1e-5, rtol=1e-5)

    print("KERNEL_OK")
</pallas_src>

<mosaic_0001>
module attributes {stable_mosaic.version = 11 : i64} {
  func.func @outconv_kernel(%arg0: i32, %arg1: i32, %arg2: memref<2x4x16xf32, #tpu.memory_space<vmem>>, %arg3: memref<3x4xf32, #tpu.memory_space<vmem>>, %arg4: memref<3x1xf32, #tpu.memory_space<vmem>>, %arg5: memref<2x3x16xf32, #tpu.memory_space<vmem>>) attributes {dimension_semantics = [#tpu.dimension_semantics<parallel>, #tpu.dimension_semantics<parallel>], iteration_bounds = array<i64: 1, 1>, scalar_prefetch = 0 : i64, scratch_operands = 0 : i64, tpu.core_type = #tpu.core_type<tc>, window_params = [{transform_indices = @transform_0, window_bounds = array<i64: 2, 4, 16>}, {pipeline_mode = #tpu.pipeline_mode<synchronous>, transform_indices = @transform_1, window_bounds = array<i64: 3, 4>}, {pipeline_mode = #tpu.pipeline_mode<synchronous>, transform_indices = @transform_2, window_bounds = array<i64: 3, 1>}, {transform_indices = @transform_3, window_bounds = array<i64: 2, 3, 16>}]} {
    %c0 = arith.constant 0 : index
    %c0_0 = arith.constant 0 : index
    %0 = vector.load %arg3[%c0, %c0_0] : memref<3x4xf32, #tpu.memory_space<vmem>>, vector<3x4xf32>
    %c0_1 = arith.constant 0 : index
    %c0_2 = arith.constant 0 : index
    %1 = vector.load %arg4[%c0_1, %c0_2] : memref<3x1xf32, #tpu.memory_space<vmem>>, vector<3x1xf32>
    %2 = vector.shape_cast %1 : vector<3x1xf32> to vector<3x1xf32>
    %3 = vector.broadcast %2 : vector<3x1xf32> to vector<3x16xf32>
    %c0_3 = arith.constant 0 : index
    %c0_4 = arith.constant 0 : index
    %c0_5 = arith.constant 0 : index
    %4 = vector.load %arg2[%c0_3, %c0_4, %c0_5] : memref<2x4x16xf32, #tpu.memory_space<vmem>>, vector<1x4x16xf32>
    %5 = vector.shape_cast %4 : vector<1x4x16xf32> to vector<4x16xf32>
    %cst = arith.constant dense<0.000000e+00> : vector<3x16xf32>
    %6 = tpu.matmul %0, %5, %cst {dimension_numbers = #tpu.dot_dimension_numbers<[1], [0], [0], [1], [0, 0, 1, 1], [], []>} : vector<3x4xf32>, vector<4x16xf32>, vector<3x16xf32> -> vector<3x16xf32>
    %7 = arith.addf %6, %3 : vector<3x16xf32>
    %c0_6 = arith.constant 0 : index
    %c0_7 = arith.constant 0 : index
    %c0_8 = arith.constant 0 : index
    %8 = vector.load %arg5[%c0_6, %c0_7, %c0_8] : memref<2x3x16xf32, #tpu.memory_space<vmem>>, vector<1x3x16xf32>
    %9 = vector.shape_cast %8 : vector<1x3x16xf32> to vector<3x16xf32>
    %10 = vector.shape_cast %7 : vector<3x16xf32> to vector<1x3x16xf32>
    tpu.vector_store %arg5[%c0_6, %c0_7, %c0_8], %10 {strides = array<i32>} : memref<2x3x16xf32, #tpu.memory_space<vmem>>, vector<1x3x16xf32>,
    %c1 = arith.constant 1 : index
    %c0_9 = arith.constant 0 : index
    %c0_10 = arith.constant 0 : index
    %11 = vector.load %arg2[%c1, %c0_9, %c0_10] : memref<2x4x16xf32, #tpu.memory_space<vmem>>, vector<1x4x16xf32>
    %12 = vector.shape_cast %11 : vector<1x4x16xf32> to vector<4x16xf32>
    %cst_11 = arith.constant dense<0.000000e+00> : vector<3x16xf32>
    %13 = tpu.matmul %0, %12, %cst_11 {dimension_numbers = #tpu.dot_dimension_numbers<[1], [0], [0], [1], [0, 0, 1, 1], [], []>} : vector<3x4xf32>, vector<4x16xf32>, vector<3x16xf32> -> vector<3x16xf32>
    %14 = arith.addf %13, %3 : vector<3x16xf32>
    %c1_12 = arith.constant 1 : index
    %c0_13 = arith.constant 0 : index
    %c0_14 = arith.constant 0 : index
    %15 = vector.load %arg5[%c1_12, %c0_13, %c0_14] : memref<2x3x16xf32, #tpu.memory_space<vmem>>, vector<1x3x16xf32>
    %16 = vector.shape_cast %15 : vector<1x3x16xf32> to vector<3x16xf32>
    %17 = vector.shape_cast %14 : vector<3x16xf32> to vector<1x3x16xf32>
    tpu.vector_store %arg5[%c1_12, %c0_13, %c0_14], %17 {strides = array<i32>} : memref<2x3x16xf32, #tpu.memory_space<vmem>>, vector<1x3x16xf32>,
    return
  }
  func.func @transform_0(%arg0: i32, %arg1: i32) -> (i32, i32, i32) {
    %c0_i32 = arith.constant 0 : i32
    %c0_i32_0 = arith.constant 0 : i32
    return %arg1, %c0_i32, %arg0 : i32, i32, i32
  }
  func.func @transform_1(%arg0: i32, %arg1: i32) -> (i32, i32) {
    %c0_i32 = arith.constant 0 : i32
    %c0_i32_0 = arith.constant 0 : i32
    %c0_i32_1 = arith.constant 0 : i32
    return %c0_i32, %c0_i32_0 : i32, i32
  }
  func.func @transform_2(%arg0: i32, %arg1: i32) -> (i32, i32) {
    %c0_i32 = arith.constant 0 : i32
    %c0_i32_0 = arith.constant 0 : i32
    %c0_i32_1 = arith.constant 0 : i32
    return %c0_i32, %c0_i32_0 : i32, i32
  }
  func.func @transform_3(%arg0: i32, %arg1: i32) -> (i32, i32, i32) {
    %c0_i32 = arith.constant 0 : i32
    %c0_i32_0 = arith.constant 0 : i32
    return %arg1, %c0_i32, %arg0 : i32, i32, i32
  }
}

</mosaic_0001>

<bundles_post_ra>
// kernel: tpu_custom_call.1
= control target key start
LH: loop header
LB: loop body
LE: loop exit
PB: predicated region body
PF: predicated region fallthrough
CT: control target
= control target key end

     0   :  { %8 = vsyncpa [#allocation3], 0  ;;  %s136_s15 = smov [#allocation2]   ;;  %s137_s17 = smov 64   ;;  %s175_s0 = inlined_call_operand.hbm [shape: f32[2,4,16], index: 0, kind: input, shape index: {}]   ;;  %s176_s1 = inlined_call_operand.vmem [shape: f32[3,4], index: 1, kind: input, shape index: {}]   ;;  %s177_s2 = inlined_call_operand.vmem [shape: f32[3,1], index: 2, kind: input, shape index: {}]   ;;  %s178_s3 = inlined_call_operand.vmem [shape: f32[2,3,16], index: 3, kind: output, shape index: {}]  }
   0x1   :  { %s13_s14 = sshll.u32 %s175_s0, 4  ;;  %s15_s16 = sshll.u32 %s136_s15, 4  ;;  %s14_s14 = int_to_ptr.hbm [resolvable:$true] %s13_s14  ;;  %s16_s16 = int_to_ptr.vmem [resolvable:$true] %s15_s16 }
   0x2   :  { %s138_s18 = smov 4  }
   0x3   :  { %21 = dma.hbm_to_vmem [thread:$0]  %s14_s14, 128, %s16_s16, [#allocation3], %s137_s17, %s137_s17, %s138_s18  }
   0x4   :  { %134 = dma.done.wait [#allocation3], 128  }
   0x5   :  { %135 = vsyncadd [#allocation3], 4294967168  ;;  %v139_v0 = vmov 0   ;;  %vm42_vm0 = vcmask 1043456   ;;  %vm38_vm1 = vcmask 31744   ;;  %vm66_vm2 = vcmask 124928  }
   0x6   :  { %109 = vset.pattern.permute.xlu0 %v139_v0  ;;  %v37_v1 = vld [vmem:[#allocation2] sm:$0xf]  ;;  %v69_v2 = vld [vmem:[#allocation2 + $0x4] sm:$0xf] }
   0x7   :  { %v30_v3 = vld [vmem:[%s176_s1] sm:$0x7]  ;;  %100 = vmatpush.msk.msra.mxu0 %vm42_vm0, %v37_v1  ;;  %102 = vmatpush.msk.msra.mxu1 %vm42_vm0, %v69_v2 }
   0x8   :  { %v31_v4 = vld [vmem:[%s177_s2] sm:$0x7]  ;;  %101 = vmatmul.msk.f32.vlgmr.msra.gmra.mxu0 %vm38_vm1, %v30_v3  ;;  %103 = vmatmul.msk.f32.vlgmr.msra.gmra.mxu1 %vm38_vm1, %v30_v3 }
   0x9   :  { %34 = vperm.xlu0 %109, %v31_v4  }
  0x7b   :  { %v35_v5 = vpop.permute.xlu0 %34 }
  0x85   :  { %v63_v6 = vpop.f32.mrf.mxu0  ;;  %v90_v7 = vpop.f32.mrf.mxu1 }
  0x86   :  { %v64_v8 = vadd.f32 %v63_v6, %v35_v5  ;;  %v91_v9 = vadd.f32 %v90_v7, %v35_v5 }
  0x88   :  { %67 = vst.msk [vmem:[%s178_s3] sm:$0x7] %vm66_vm2, %v64_v8 }
  0x89   :  { %104 = vst.msk [vmem:[%s178_s3 + $0x4] sm:$0x7] %vm66_vm2, %v91_v9 }
  0x8a   :  { %99 = vsyncpa [#allocation3], 1 }

</bundles_post_ra>
